<compile_context>
chip_gen: v7x
topology: tpu7x:2x2x1
jax: 0.10.0
libtpu: 0.0.40
codegen_flags: <defaults>
</compile_context>

<pallas_src>
import jax
import jax.numpy as jnp
from jax.experimental import pallas as pl
from jax.experimental.pallas import tpu as pltpu

# ---- "cfg" sizes (synthetic, deterministic) -------------------------------
VOCABSIZE = 32       # cfg.CHAR.VOCABSIZE
CHARVEC_DIM = 16     # cfg.CHARVEC.DIMENSION
POKEMON_SIZE = 24    # cfg.POKEMON.SIZE
POKEMON_DIM = 16     # cfg.POKEMON.DIMENSION
HID_DIM = 32         # cfg.CHARLSTM.DIMENSION
BATCH = 8            # keep a multiple of 8 (one f32 sublane tile)
SEQ = 6              # decode steps for the demo

INPUT_DIM = CHARVEC_DIM + POKEMON_DIM       # LSTM input size (32)
OUT_DIM = VOCABSIZE + POKEMON_SIZE          # fc_out output size (56)
GATE_DIM = 4 * HID_DIM                      # 128

# ---- packed activation slab lane layout (B, 128) --------------------------
ONEHOT_W = VOCABSIZE + 1                    # 33
ONEHOT_OFF = 0
POKE_OFF = ONEHOT_OFF + ONEHOT_W            # 33
H_OFF = POKE_OFF + POKEMON_SIZE             # 57
PAD_OFF = H_OFF + HID_DIM                   # 89
BIAS_LANE = 95                              # "ones" lane -> fused bias row
C_OFF = 96                                  # unused rows (zero weights)
ACT_W = 128

# ---- packed output slab lane layout (B, 128) ------------------------------
PRED_PAD_W = 64                             # pred (56) zero-padded to 64 lanes
OUT_H_OFF = PRED_PAD_W                      # 64
OUT_C_OFF = PRED_PAD_W + HID_DIM            # 96
OUT_W = 128


def decoder_kernel(tok_ref, poke_ref, h0_ref, c0_ref, wg_ref, wo_ref,
                   out_ref, h_sc, c_sc):
    """One grid step t = one decoder step.

    tok_ref : (1, B, 1) int32   token ids for step t
    poke_ref: (B, POKE_SIZE) f32  (VMEM-resident, constant index_map)
    h0_ref/c0_ref: (B, H) f32   initial state (read only at t == 0)
    wg_ref  : (128, 128) bf16   fused gate weight slab (VMEM-resident)
    wo_ref  : (33, 64)  f32     fc_out weight(32 rows)+bias(row 32) slab
    out_ref : (1, B, 128) f32   [pred(56)+pad | h | c] for step t
    h_sc/c_sc: (B, H) f32       state carried across grid steps in VMEM
    """
    t = pl.program_id(0)
    b = poke_ref.shape[0]
    h = HID_DIM

    @pl.when(t == 0)
    def _init():
        h_sc[...] = h0_ref[...]
        c_sc[...] = c0_ref[...]

    h_prev = h_sc[...]
    c_prev = c_sc[...]

    # In-kernel one-hot: iota over lanes compared against the step-t ids.
    ids = tok_ref[0]                                            # (B, 1) int32
    lanes = jax.lax.broadcasted_iota(jnp.int32, (b, ONEHOT_W), 1)
    onehot = (lanes == ids).astype(jnp.float32)                 # (B, 33)

    # Pack all per-step activations into one lane-dense (B, 128) slab:
    # [onehot(33) | poke(24) | h(32) | zeros(6) | one(1) | zeros(32)].
    act = jnp.concatenate(
        [onehot,
         poke_ref[...],
         h_prev,
         jnp.zeros((b, BIAS_LANE - PAD_OFF), jnp.float32),
         jnp.ones((b, 1), jnp.float32),
         jnp.zeros((b, ACT_W - C_OFF), jnp.float32)],
        axis=1)                                                 # (B, 128) f32

    # Single fused MXU push (bf16 operands, f32 accumulation): embedding
    # gather + pokemon Linear + LSTM input/hidden projections + biases.
    gates = jnp.dot(act.astype(jnp.bfloat16), wg_ref[...],
                    preferred_element_type=jnp.float32)         # (B, 128) f32

    # Two full-vreg transcendental passes, then slice i/f/g/o.
    sig = jax.nn.sigmoid(gates)
    tnh = jnp.tanh(gates)
    i_g = sig[:, 0 * h:1 * h]
    f_g = sig[:, 1 * h:2 * h]
    g_g = tnh[:, 2 * h:3 * h]
    o_g = sig[:, 3 * h:4 * h]

    c_new = f_g * c_prev + i_g * g_g
    h_new = o_g * jnp.tanh(c_new)
    h_sc[...] = h_new
    c_sc[...] = c_new

    # fc_out (f32 MXU push): weights rows 0:H, bias row H; padded to 64 lanes.
    pred = (jnp.dot(h_new, wo_ref[:h, :], preferred_element_type=jnp.float32)
            + wo_ref[h:h + 1, :])                               # (B, 64)

    # One lane-dense 128-wide store: [pred64 | h_new | c_new].
    out_ref[0] = jnp.concatenate([pred, h_new, c_new], axis=1)


def fuse_params(p):
    """Fold embedding / pokemon Linear / LSTM projections into two weight slabs.

    Done once at init time (host-side, f32), gate slab stored as bf16.
    """
    w_ih_word = p["w_ih"][:CHARVEC_DIM]                         # (16, 128)
    w_ih_poke = p["w_ih"][CHARVEC_DIM:]                         # (16, 128)

    emb_fold = p["emb_table"] @ w_ih_word                       # (33, 128)
    pok_fold = p["w_pok"] @ w_ih_poke                           # (24, 128)
    b_fused = p["b_ih"] + p["b_hh"] + p["b_pok"] @ w_ih_poke    # (1, 128)

    w_gates = jnp.zeros((ACT_W, GATE_DIM), jnp.float32)
    w_gates = w_gates.at[ONEHOT_OFF:ONEHOT_OFF + ONEHOT_W].set(emb_fold)
    w_gates = w_gates.at[POKE_OFF:POKE_OFF + POKEMON_SIZE].set(pok_fold)
    w_gates = w_gates.at[H_OFF:H_OFF + HID_DIM].set(p["w_hh"])
    w_gates = w_gates.at[BIAS_LANE:BIAS_LANE + 1].set(b_fused)
    # rows [89:95) and [96:128) stay zero -> pad/unused lanes contribute 0.

    w_out_pad = jnp.zeros((HID_DIM, PRED_PAD_W), jnp.float32).at[:, :OUT_DIM].set(p["w_out"])
    b_out_pad = jnp.zeros((1, PRED_PAD_W), jnp.float32).at[:, :OUT_DIM].set(p["b_out"])
    w_out_slab = jnp.concatenate([w_out_pad, b_out_pad], axis=0)  # (33, 64)

    return {"w_gates": w_gates.astype(jnp.bfloat16),   # bf16 MXU operand
            "w_out_slab": w_out_slab}                  # f32 (tiny)


@jax.jit
def decoder_decode(tokens, embedding, hidden, cell, fused):
    """Teacher-forced T-step decode, one pallas_call for the whole loop.

    tokens: (T, B) int32; embedding: (B, POKE_SIZE); hidden/cell: (1, B, H).
    Returns (output_word (T,B,V), output_emb (T,B,POKE), hidden, cell).
    """
    t_len, b = tokens.shape
    tok3 = tokens.astype(jnp.int32).reshape(t_len, b, 1)
    poke = embedding.astype(jnp.float32)
    h0 = hidden[0].astype(jnp.float32)
    c0 = cell[0].astype(jnp.float32)

    out = pl.pallas_call(
        decoder_kernel,
        out_shape=jax.ShapeDtypeStruct((t_len, b, OUT_W), jnp.float32),
        grid_spec=pltpu.PrefetchScalarGridSpec(
            num_scalar_prefetch=0,
            grid=(t_len,),
            in_specs=[
                # per-step token ids: tiny (1,B,1) block, advances with t
                pl.BlockSpec((1, b, 1), lambda t: (t, 0, 0)),
                # everything below: full-shape blocks, constant index_map
                # -> DMA'd once, VMEM-resident across all T steps
                pl.BlockSpec((b, POKEMON_SIZE), lambda t: (0, 0)),
                pl.BlockSpec((b, HID_DIM), lambda t: (0, 0)),
                pl.BlockSpec((b, HID_DIM), lambda t: (0, 0)),
                pl.BlockSpec((ACT_W, GATE_DIM), lambda t: (0, 0)),
                pl.BlockSpec((HID_DIM + 1, PRED_PAD_W), lambda t: (0, 0)),
            ],
            out_specs=pl.BlockSpec((1, b, OUT_W), lambda t: (t, 0, 0)),
            scratch_shapes=[pltpu.VMEM((b, HID_DIM), jnp.float32),   # h carry
                            pltpu.VMEM((b, HID_DIM), jnp.float32)],  # c carry
        ),
        compiler_params=pltpu.CompilerParams(
            dimension_semantics=("arbitrary",)),   # sequential token loop
    )(tok3, poke, h0, c0, fused["w_gates"], fused["w_out_slab"])

    # Unpack ONCE after the whole decode (not per step).
    output_word = out[:, :, :VOCABSIZE]
    output_emb = out[:, :, VOCABSIZE:OUT_DIM]
    h_new = out[-1, :, OUT_H_OFF:OUT_H_OFF + HID_DIM]
    c_new = out[-1, :, OUT_C_OFF:OUT_C_OFF + HID_DIM]
    return output_word, output_emb, h_new[None], c_new[None]


def decoder_forward(sentence, embedding, hidden, cell, fused):
    """Exact module-signature single-step forward (T = 1)."""
    ow, oe, h, c = decoder_decode(sentence[None, :], embedding, hidden, cell, fused)
    return ow[0], oe[0], h, c


# TODO(synk): for v7x multi-stream decode, add a leading "parallel" grid axis
# over independent sequences/beams to engage the second TensorCore.


def init_params(key):
    ks = jax.random.split(key, 8)
    scale = 0.1
    return {
        # nn.Embedding(VOCABSIZE + 1, CHARVEC_DIM)
        "emb_table": scale * jax.random.normal(
            ks[0], (VOCABSIZE + 1, CHARVEC_DIM), jnp.float32),
        # nn.Linear(POKEMON_SIZE, POKEMON_DIM)  (stored transposed: x @ W)
        "w_pok": scale * jax.random.normal(
            ks[1], (POKEMON_SIZE, POKEMON_DIM), jnp.float32),
        "b_pok": scale * jax.random.normal(ks[2], (1, POKEMON_DIM), jnp.float32),
        # nn.LSTM(INPUT_DIM, HID_DIM, 1): W_ih (4H, in) / W_hh (4H, H), transposed
        "w_ih": scale * jax.random.normal(
            ks[3], (INPUT_DIM, 4 * HID_DIM), jnp.float32),
        "b_ih": scale * jax.random.normal(ks[4], (1, 4 * HID_DIM), jnp.float32),
        "w_hh": scale * jax.random.normal(
            ks[5], (HID_DIM, 4 * HID_DIM), jnp.float32),
        "b_hh": scale * jax.random.normal(ks[6], (1, 4 * HID_DIM), jnp.float32),
        # nn.Linear(HID_DIM, VOCABSIZE + POKEMON_SIZE), transposed
        "w_out": scale * jax.random.normal(
            ks[7], (HID_DIM, OUT_DIM), jnp.float32),
        "b_out": jnp.zeros((1, OUT_DIM), jnp.float32),
    }


def decoder_reference(sentence, embedding, hidden, cell, p):
    """Pure-JAX f32 reference of the PyTorch single-step forward."""
    word_emb = p["emb_table"][sentence]                       # (B, CHARVEC)
    pok_emb = embedding @ p["w_pok"] + p["b_pok"]
    x = jnp.concatenate([word_emb, pok_emb], axis=1)
    h0, c0 = hidden[0], cell[0]
    gates = x @ p["w_ih"] + p["b_ih"] + h0 @ p["w_hh"] + p["b_hh"]
    i, f, g, o = jnp.split(gates, 4, axis=1)
    c_new = jax.nn.sigmoid(f) * c0 + jax.nn.sigmoid(i) * jnp.tanh(g)
    h_new = jax.nn.sigmoid(o) * jnp.tanh(c_new)
    pred = h_new @ p["w_out"] + p["b_out"]
    return pred[:, :VOCABSIZE], pred[:, VOCABSIZE:], h_new[None], c_new[None]


def decoder_reference_decode(tokens, embedding, hidden, cell, p):
    words, embs = [], []
    h, c = hidden, cell
    for t in range(tokens.shape[0]):
        w, e, h, c = decoder_reference(tokens[t], embedding, h, c, p)
        words.append(w)
        embs.append(e)
    return jnp.stack(words), jnp.stack(embs), h, c


if __name__ == "__main__":
    key = jax.random.PRNGKey(0)
    k_sent, k_emb, k_h, k_c, k_par = jax.random.split(key, 5)

    tokens = jax.random.randint(k_sent, (SEQ, BATCH), 0, VOCABSIZE + 1, jnp.int32)
    embedding = jax.random.normal(k_emb, (BATCH, POKEMON_SIZE), jnp.float32)
    hidden = jax.random.normal(k_h, (1, BATCH, HID_DIM), jnp.float32)
    cell = jax.random.normal(k_c, (1, BATCH, HID_DIM), jnp.float32)
    params = init_params(k_par)
    fused = fuse_params(params)            # one-time host-side weight folding

    # Multi-step (in-kernel token loop) path.
    ow, oe, h_n, c_n = decoder_decode(tokens, embedding, hidden, cell, fused)
    jax.block_until_ready((ow, oe, h_n, c_n))

    rw, re, rh, rc = decoder_reference_decode(tokens, embedding, hidden, cell, params)
    assert ow.shape == (SEQ, BATCH, VOCABSIZE)
    assert oe.shape == (SEQ, BATCH, POKEMON_SIZE)
    assert h_n.shape == (1, BATCH, HID_DIM) and c_n.shape == (1, BATCH, HID_DIM)
    # Tolerance loosened for the bf16 gate matmul (f32 accumulation).
    tol = dict(atol=5e-2, rtol=5e-2)
    assert jnp.allclose(ow, rw, **tol)
    assert jnp.allclose(oe, re, **tol)
    assert jnp.allclose(h_n, rh, **tol)
    assert jnp.allclose(c_n, rc, **tol)

    # Module-signature single-step path (T = 1).
    ow1, oe1, h1, c1 = decoder_forward(tokens[0], embedding, hidden, cell, fused)
    jax.block_until_ready((ow1, oe1, h1, c1))
    rw1, re1, rh1, rc1 = decoder_reference(tokens[0], embedding, hidden, cell, params)
    assert jnp.allclose(ow1, rw1, **tol)
    assert jnp.allclose(oe1, re1, **tol)
    assert jnp.allclose(h1, rh1, **tol)
    assert jnp.allclose(c1, rc1, **tol)

    print("KERNEL_OK")
</pallas_src>

<mosaic_0001>
module attributes {stable_mosaic.version = 11 : i64} {
  func.func @decoder_kernel(%arg0: i32, %arg1: memref<1x8x1xi32, #tpu.memory_space<vmem>>, %arg2: memref<8x24xf32, #tpu.memory_space<vmem>>, %arg3: memref<8x32xf32, #tpu.memory_space<vmem>>, %arg4: memref<8x32xf32, #tpu.memory_space<vmem>>, %arg5: memref<128x128xbf16, #tpu.memory_space<vmem>>, %arg6: memref<33x64xf32, #tpu.memory_space<vmem>>, %arg7: memref<1x8x128xf32, #tpu.memory_space<vmem>>, %arg8: memref<8x32xf32, #tpu.memory_space<vmem>>, %arg9: memref<8x32xf32, #tpu.memory_space<vmem>>) attributes {dimension_semantics = [#tpu.dimension_semantics<arbitrary>], iteration_bounds = array<i64: 6>, scalar_prefetch = 0 : i64, scratch_operands = 2 : i64, tpu.core_type = #tpu.core_type<tc>, window_params = [{transform_indices = @transform_0, window_bounds = array<i64: 1, 8, 1>}, {pipeline_mode = #tpu.pipeline_mode<synchronous>, transform_indices = @transform_1, window_bounds = array<i64: 8, 24>}, {pipeline_mode = #tpu.pipeline_mode<synchronous>, transform_indices = @transform_2, window_bounds = array<i64: 8, 32>}, {pipeline_mode = #tpu.pipeline_mode<synchronous>, transform_indices = @transform_3, window_bounds = array<i64: 8, 32>}, {pipeline_mode = #tpu.pipeline_mode<synchronous>, transform_indices = @transform_4, window_bounds = array<i64: 128, 128>}, {pipeline_mode = #tpu.pipeline_mode<synchronous>, transform_indices = @transform_5, window_bounds = array<i64: 33, 64>}, {transform_indices = @transform_6, window_bounds = array<i64: 1, 8, 128>}]} {
    %c0_i32 = arith.constant 0 : i32
    %0 = arith.cmpi eq, %arg0, %c0_i32 : i32
    %1 = arith.extui %0 : i1 to i32
    %c0_i32_0 = arith.constant 0 : i32
    %2 = arith.cmpi ne, %1, %c0_i32_0 : i32
    scf.if %2 {
      %c0_26 = arith.constant 0 : index
      %c0_27 = arith.constant 0 : index
      %46 = vector.load %arg3[%c0_26, %c0_27] : memref<8x32xf32, #tpu.memory_space<vmem>>, vector<8x32xf32>
      %c0_28 = arith.constant 0 : index
      %c0_29 = arith.constant 0 : index
      %47 = vector.load %arg8[%c0_28, %c0_29] : memref<8x32xf32, #tpu.memory_space<vmem>>, vector<8x32xf32>
      tpu.vector_store %arg8[%c0_28, %c0_29], %46 {strides = array<i32>} : memref<8x32xf32, #tpu.memory_space<vmem>>, vector<8x32xf32>,
      %c0_30 = arith.constant 0 : index
      %c0_31 = arith.constant 0 : index
      %48 = vector.load %arg4[%c0_30, %c0_31] : memref<8x32xf32, #tpu.memory_space<vmem>>, vector<8x32xf32>
      %c0_32 = arith.constant 0 : index
      %c0_33 = arith.constant 0 : index
      %49 = vector.load %arg9[%c0_32, %c0_33] : memref<8x32xf32, #tpu.memory_space<vmem>>, vector<8x32xf32>
      tpu.vector_store %arg9[%c0_32, %c0_33], %48 {strides = array<i32>} : memref<8x32xf32, #tpu.memory_space<vmem>>, vector<8x32xf32>,
    } else {
    }
    %c0 = arith.constant 0 : index
    %c0_1 = arith.constant 0 : index
    %3 = vector.load %arg8[%c0, %c0_1] : memref<8x32xf32, #tpu.memory_space<vmem>>, vector<8x32xf32>
    %c0_2 = arith.constant 0 : index
    %c0_3 = arith.constant 0 : index
    %4 = vector.load %arg9[%c0_2, %c0_3] : memref<8x32xf32, #tpu.memory_space<vmem>>, vector<8x32xf32>
    %c0_4 = arith.constant 0 : index
    %c0_5 = arith.constant 0 : index
    %c0_6 = arith.constant 0 : index
    %5 = vector.load %arg1[%c0_4, %c0_5, %c0_6] : memref<1x8x1xi32, #tpu.memory_space<vmem>>, vector<1x8x1xi32>
    %6 = vector.shape_cast %5 : vector<1x8x1xi32> to vector<8x1xi32>
    %7 = tpu.iota {dimensions = array<i32: 1>} : vector<8x33xi32>
    %8 = vector.broadcast %6 : vector<8x1xi32> to vector<8x33xi32>
    %9 = arith.cmpi eq, %7, %8 : vector<8x33xi32>
    %10 = arith.extui %9 : vector<8x33xi1> to vector<8x33xi32>
    %11 = arith.sitofp %10 : vector<8x33xi32> to vector<8x33xf32>
    %c0_7 = arith.constant 0 : index
    %c0_8 = arith.constant 0 : index
    %12 = vector.load %arg2[%c0_7, %c0_8] : memref<8x24xf32, #tpu.memory_space<vmem>>, vector<8x24xf32>
    %cst = arith.constant 0.000000e+00 : f32
    %13 = vector.broadcast %cst : f32 to vector<8x6xf32>
    %cst_9 = arith.constant 1.000000e+00 : f32
    %14 = vector.broadcast %cst_9 : f32 to vector<8x1xf32>
    %cst_10 = arith.constant 0.000000e+00 : f32
    %15 = vector.broadcast %cst_10 : f32 to vector<8x32xf32>
    %16 = tpu.concatenate %11, %12, %3, %13, %14, %15 in 1 : vector<8x33xf32>, vector<8x24xf32>, vector<8x32xf32>, vector<8x6xf32>, vector<8x1xf32>, vector<8x32xf32> -> vector<8x128xf32>
    %17 = arith.truncf %16 : vector<8x128xf32> to vector<8x128xbf16>
    %c0_11 = arith.constant 0 : index
    %c0_12 = arith.constant 0 : index
    %18 = vector.load %arg5[%c0_11, %c0_12] : memref<128x128xbf16, #tpu.memory_space<vmem>>, vector<128x128xbf16>
    %cst_13 = arith.constant dense<0.000000e+00> : vector<8x128xf32>
    %19 = tpu.matmul %17, %18, %cst_13 {dimension_numbers = #tpu.dot_dimension_numbers<[1], [0], [0], [1], [0, 0, 1, 1], [], []>} : vector<8x128xbf16>, vector<128x128xbf16>, vector<8x128xf32> -> vector<8x128xf32>
    %20 = arith.negf %19 : vector<8x128xf32>
    %21 = math.exp %20 : vector<8x128xf32>
    %cst_14 = arith.constant 1.000000e+00 : f32
    %22 = vector.broadcast %cst_14 : f32 to vector<8x128xf32>
    %23 = arith.addf %22, %21 : vector<8x128xf32>
    %24 = arith.divf %22, %23 : vector<8x128xf32>
    %25 = math.tanh %19 : vector<8x128xf32>
    %26 = vector.extract_strided_slice %24 {offsets = [0, 0], sizes = [8, 32], strides = [1, 1]} : vector<8x128xf32> to vector<8x32xf32>
    %27 = vector.extract_strided_slice %24 {offsets = [0, 32], sizes = [8, 32], strides = [1, 1]} : vector<8x128xf32> to vector<8x32xf32>
    %28 = vector.extract_strided_slice %25 {offsets = [0, 64], sizes = [8, 32], strides = [1, 1]} : vector<8x128xf32> to vector<8x32xf32>
    %29 = vector.extract_strided_slice %24 {offsets = [0, 96], sizes = [8, 32], strides = [1, 1]} : vector<8x128xf32> to vector<8x32xf32>
    %30 = arith.mulf %27, %4 : vector<8x32xf32>
    %31 = arith.mulf %26, %28 : vector<8x32xf32>
    %32 = arith.addf %30, %31 : vector<8x32xf32>
    %33 = math.tanh %32 : vector<8x32xf32>
    %34 = arith.mulf %29, %33 : vector<8x32xf32>
    %c0_15 = arith.constant 0 : index
    %c0_16 = arith.constant 0 : index
    %35 = vector.load %arg8[%c0_15, %c0_16] : memref<8x32xf32, #tpu.memory_space<vmem>>, vector<8x32xf32>
    tpu.vector_store %arg8[%c0_15, %c0_16], %34 {strides = array<i32>} : memref<8x32xf32, #tpu.memory_space<vmem>>, vector<8x32xf32>,
    %c0_17 = arith.constant 0 : index
    %c0_18 = arith.constant 0 : index
    %36 = vector.load %arg9[%c0_17, %c0_18] : memref<8x32xf32, #tpu.memory_space<vmem>>, vector<8x32xf32>
    tpu.vector_store %arg9[%c0_17, %c0_18], %32 {strides = array<i32>} : memref<8x32xf32, #tpu.memory_space<vmem>>, vector<8x32xf32>,
    %c0_19 = arith.constant 0 : index
    %c0_20 = arith.constant 0 : index
    %37 = vector.load %arg6[%c0_19, %c0_20] : memref<33x64xf32, #tpu.memory_space<vmem>>, vector<32x64xf32>
    %cst_21 = arith.constant dense<0.000000e+00> : vector<8x64xf32>
    %38 = tpu.matmul %34, %37, %cst_21 {dimension_numbers = #tpu.dot_dimension_numbers<[1], [0], [0], [1], [0, 0, 1, 1], [], []>} : vector<8x32xf32>, vector<32x64xf32>, vector<8x64xf32> -> vector<8x64xf32>
    %c32 = arith.constant 32 : index
    %c0_22 = arith.constant 0 : index
    %39 = vector.load %arg6[%c32, %c0_22] : memref<33x64xf32, #tpu.memory_space<vmem>>, vector<1x64xf32>
    %40 = vector.broadcast %39 : vector<1x64xf32> to vector<8x64xf32>
    %41 = arith.addf %38, %40 : vector<8x64xf32>
    %42 = tpu.concatenate %41, %34, %32 in 1 : vector<8x64xf32>, vector<8x32xf32>, vector<8x32xf32> -> vector<8x128xf32>
    %c0_23 = arith.constant 0 : index
    %c0_24 = arith.constant 0 : index
    %c0_25 = arith.constant 0 : index
    %43 = vector.load %arg7[%c0_23, %c0_24, %c0_25] : memref<1x8x128xf32, #tpu.memory_space<vmem>>, vector<1x8x128xf32>
    %44 = vector.shape_cast %43 : vector<1x8x128xf32> to vector<8x128xf32>
    %45 = vector.shape_cast %42 : vector<8x128xf32> to vector<1x8x128xf32>
    tpu.vector_store %arg7[%c0_23, %c0_24, %c0_25], %45 {strides = array<i32>} : memref<1x8x128xf32, #tpu.memory_space<vmem>>, vector<1x8x128xf32>,
    return
  }
  func.func @transform_0(%arg0: i32) -> (i32, i32, i32) {
    %c0_i32 = arith.constant 0 : i32
    %c0_i32_0 = arith.constant 0 : i32
    %c0_i32_1 = arith.constant 0 : i32
    return %arg0, %c0_i32, %c0_i32_0 : i32, i32, i32
  }
  func.func @transform_1(%arg0: i32) -> (i32, i32) {
    %c0_i32 = arith.constant 0 : i32
    %c0_i32_0 = arith.constant 0 : i32
    %c0_i32_1 = arith.constant 0 : i32
    return %c0_i32, %c0_i32_0 : i32, i32
  }
  func.func @transform_2(%arg0: i32) -> (i32, i32) {
    %c0_i32 = arith.constant 0 : i32
    %c0_i32_0 = arith.constant 0 : i32
    %c0_i32_1 = arith.constant 0 : i32
    return %c0_i32, %c0_i32_0 : i32, i32
  }
  func.func @transform_3(%arg0: i32) -> (i32, i32) {
    %c0_i32 = arith.constant 0 : i32
    %c0_i32_0 = arith.constant 0 : i32
    %c0_i32_1 = arith.constant 0 : i32
    return %c0_i32, %c0_i32_0 : i32, i32
  }
  func.func @transform_4(%arg0: i32) -> (i32, i32) {
    %c0_i32 = arith.constant 0 : i32
    %c0_i32_0 = arith.constant 0 : i32
    %c0_i32_1 = arith.constant 0 : i32
    return %c0_i32, %c0_i32_0 : i32, i32
  }
  func.func @transform_5(%arg0: i32) -> (i32, i32) {
    %c0_i32 = arith.constant 0 : i32
    %c0_i32_0 = arith.constant 0 : i32
    %c0_i32_1 = arith.constant 0 : i32
    return %c0_i32, %c0_i32_0 : i32, i32
  }
  func.func @transform_6(%arg0: i32) -> (i32, i32, i32) {
    %c0_i32 = arith.constant 0 : i32
    %c0_i32_0 = arith.constant 0 : i32
    %c0_i32_1 = arith.constant 0 : i32
    return %arg0, %c0_i32, %c0_i32_0 : i32, i32, i32
  }
}

</mosaic_0001>

<bundles_post_ra>
// kernel: decoder_decode.1
= control target key start
LH: loop header
LB: loop body
LE: loop exit
PB: predicated region body
PF: predicated region fallthrough
CT: control target
= control target key end

     0   :  { %11 = vsyncpa [#allocation5], 0  ;;  %s1020_s0 = inlined_call_operand.vmem [shape: s32[6,8,1], index: 0, kind: input, shape index: {}]   ;;  %s1021_s1 = inlined_call_operand.vmem [shape: f32[8,24], index: 1, kind: input, shape index: {}]   ;;  %s1022_s2 = inlined_call_operand.vmem [shape: f32[8,32], index: 2, kind: input, shape index: {}]   ;;  %s1023_s3 = inlined_call_operand.hbm [shape: f32[8,32], index: 3, kind: input, shape index: {}]   ;;  %s1024_s4 = inlined_call_operand.vmem [shape: bf16[128,128], index: 4, kind: input, shape index: {}]   ;;  %s1025_s5 = inlined_call_operand.hbm [shape: f32[33,64], index: 5, kind: input, shape index: {}]   ;;  %s1026_s6 = inlined_call_operand.vmem [shape: f32[6,8,128], index: 6, kind: output, shape index: {}]  }
   0x1   :  { %12 = vsyncpa [#allocation7], 0  ;;  %s882_s21 = smov 0  }
   0x2 LB: > { %s888_s22 = sadd.s32 4294967295, %s832_s21   ;;  %p627_p0 = scmp.ge.s32.totalorder %s832_s21, 1  ;;  %s832_s21 = sphi %s882_s21, %s18_s21  }
   0x3   : > { %p180_p1 = scmp.lt.s32.totalorder %s832_s21, 7  ;;  %p1027_p3 = scmp.eq.s32.totalorder %s888_s22, 0 }
   0x4   : > { %s834_s23 = smov [#allocation4]   ;;  %s835_s26 = smov [#allocation6]  }
   0x5   : > { %s199_s24 = sshll.u32 %s834_s23, 4  ;;  %p894_p4 = pnand %p627_p0, %p180_p1  ;;  %s200_s24 = int_to_ptr.vmem [resolvable:$true] %s199_s24 }
   0x6   : > { %s212_s27 = sshll.u32 %s835_s26, 4  ;;  %s762_s7 = scalar_lea.hbm %s1023_s3, 128  ;;  %s906_s27 = int_to_ptr.vmem [resolvable:$true] %s212_s27 }
   0x7   : > { %s1029_s25 = scalar_select %p894_p4, 1, 0 }
   0x8   : > { %p713_p5 = pneg %p894_p4  ;;  %p763_p7 = scmp.ne.s32.totalorder %s1023_s3, %s762_s7 }
   0x9   : > { %p769_p11 = scmp.lt.u32.totalorder %s762_s7, %s1023_s3 }
   0xa   : > { %p902_p6 = pnand %p1027_p3, %p713_p5 }
   0xc   : > { %p764_p8 = pneg %p902_p6 }
   0xe   : > { %p765_p9 = pnand %p764_p8, %p763_p7 }
  0x10   : > { %p766_p10 = pneg %p765_p9 }
  0x12   : > { %p771_p12 = pnand %p769_p11, %p766_p10 }
  0x14   : > { %774 = shalt.err (!%p771_p12)
}
  0x15   : > { %s775_s12 = scalar_lea.vmem %s200_s24, 128  ;;  %p783_p5 = scmp.lt.s32.totalorder %s200_s24, %s200_s24 }
  0x16   : > { %p776_p13 = scmp.ne.s32.totalorder %s200_s24, %s775_s12  ;;  %p784_p2 = scmp.lt.s32.totalorder %s775_s12, %s775_s12 }
  0x18   : > { %p778_p0 = pnand %p776_p13, %p764_p8  ;;  %p785_p3 = por %p784_p2, %p783_p5 }
  0x1a   : > { %p779_p1 = pneg %p778_p0 }
  0x1c   : > { %p786_p4 = pnand %p785_p3, %p779_p1 }
  0x1e   : > { %789 = shalt.err (!%p786_p4)
}
  0x1f   : > { %716 = dma.hbm_to_vmem [thread:$0]  (!%p902_p6), %s1023_s3, 128, %s200_s24, [#allocation5]  }
  0x20   : > { %s790_s17 = scalar_lea.hbm %s1025_s5, 640 }
  0x21   : > { %p791_p7 = scmp.ne.s32.totalorder %s1025_s5, %s790_s17  ;;  %p797_p4 = scmp.lt.u32.totalorder %s790_s17, %s1025_s5 }
  0x23   : > { %p793_p2 = pnand %p791_p7, %p764_p8 }
  0x25   : > { %p794_p3 = pneg %p793_p2 }
  0x27   : > { %p799_p9 = pnand %p797_p4, %p794_p3 }
  0x29   : > { %802 = shalt.err (!%p799_p9)
}
  0x2a   : > { %s803_s24 = scalar_lea.vmem %s906_s27, 640  ;;  %p811_p13 = scmp.lt.s32.totalorder %s906_s27, %s906_s27 }
  0x2b   : > { %p804_p10 = scmp.ne.s32.totalorder %s906_s27, %s803_s24  ;;  %p812_p0 = scmp.lt.s32.totalorder %s803_s24, %s803_s24 }
  0x2d   : > { %p806_p11 = pnand %p804_p10, %p764_p8  ;;  %p813_p1 = por %p812_p0, %p811_p13 }
  0x2f   : > { %p807_p12 = pneg %p806_p11 }
  0x31   : > { %p814_p5 = pnand %p813_p1, %p807_p12 }
  0x33   : > { %817 = shalt.err (!%p814_p5)
}
  0x34   : > { %s836_s26 = smov 128   ;;  %s837_s29 = smov 8  }
  0x35   : > { %719 = dma.hbm_to_vmem [thread:$0]  (!%p902_p6), %s1025_s5, 640, %s906_s27, [#allocation7], %s836_s26, %s836_s26, %s837_s29  }
  0x36   : > { %p1031_p7 = scmp.ne.s32.totalorder %s1029_s25, 0 }
  0x37   : > { %p1032_p8 = scmp.eq.s32.totalorder (!%p1031_p7), %s888_s22, 0 }
  0x38   : > { %235 = sbr.rel (%p1031_p7) target bundleno = 1135 (0x46f), region = 44 }
  0x3f   : > { %823 = dma.done.wait (%p1032_p8), [#allocation5], 128   ;;  %p1033_p2 = pmov %p1032_p8 }
  0x41   : > { %825 = vsyncadd (%p1033_p2), [#allocation5], 4294967168  ;;  %p1034_p3 = pmov %p1033_p2 }
  0x42   : > { %p1035_p4 = pmov %p1033_p2 }
  0x43   : > { %827 = dma.done.wait (%p1034_p3), [#allocation7], 640  }
  0x44   : > { %829 = vsyncadd (%p1035_p4), [#allocation7], 4294966656  ;;  %p267_p9 = scmp.lt.s32.totalorder %s888_s22, 5  ;;  %p1036_p6 = scmp.ne.s32.totalorder %s888_s22, 0 }
  0x45   : > { %v280_v0 = vld [vmem:[%s1022_s2] sm:$0xff] (!%p1036_p6)  ;;  %vm281_vm0 = vcmask (!%p1036_p6), 261120   ;;  %v283_v1 = vld [vmem:[#allocation4] sm:$0xff] (!%p1036_p6) }
  0x46   : > { %s268_s28 = scalar_select %p267_p9, %s888_s22, 5 }
  0x47   : > { %279 = sbr.rel (%p1036_p6) target bundleno = 78 (0x4e), region = 56  ;;  %282 = vst.msk [vmem:[#allocation2] sm:$0xff] (!%p1036_p6), %vm281_vm0, %v280_v0  ;;  %284 = vst.msk [vmem:[#allocation3] sm:$0xff] (!%p1036_p6), %vm281_vm0, %v283_v1 }
  0x48   : > { %s634_s27 = sshll.u32 %s268_s28, 3 }
  0x49   : > { %s270_s9 = scalar_lea.vmem %s1020_s0, %s634_s27  ;;  %s973_s12 = scalar_lea.vmem %s1026_s6, %s634_s27 }
  0x4e PF: > { %v287_v2 = vld [vmem:[%s270_s9] sm:$0xff]  ;;  %v838_v4 = vmov 0   ;;  %s839_s15 = smov 57   ;;  %v840_v7 = vmov 0.0   ;;  %v747_v8 = vld [vmem:[%s1024_s4 + $0x8] sm:$0xff]   ;;  %s841_s23 = smov 33   ;;  %v288_v16 = vlaneseq }
  0x4f   : > { %v285_v3 = vld [vmem:[#allocation2] sm:$0xff]  ;;  %745 = vset.pattern.permute.xlu0 %v838_v4  ;;  %668 = vmatprep.subr.bf16.mxu0 %v840_v7  ;;  %v748_v9 = vld [vmem:[%s1024_s4 + $0x10] sm:$0xff]   ;;  %v749_v10 = vld [vmem:[%s1024_s4 + $0x18] sm:$0xff]   ;;  %vm842_vm1 = vmmov 0   ;;  %s843_s7 = smov 32   ;;  %vm305_vm3 = vcmask 269312  }
  0x50   : > { %302 = vrot.lane.b32.xlu1 %v285_v3, %s839_s15  ;;  %v746_v5 = vld [vmem:[%s1024_s4] sm:$0xff]   ;;  %291 = vperm.xlu0 %745, %v287_v2   ;;  %v286_v11 = vld [vmem:[#allocation3] sm:$0xff]  ;;  %v752_v14 = vld [vmem:[%s1024_s4 + $0x30] sm:$0xff]   ;;  %v289_v17 = vand.u32 127, %v288_v16  ;;  %vm307_vm4 = vcmask 465920   ;;  %vm309_vm5 = vcmask 728064  }
  0x51   : > { %v296_v6 = vld [vmem:[%s1021_s1] sm:$0xff]  ;;  %669 = vmatpush3.bf16.msra.mxu0 %v746_v5  ;;  %684 = vmatprep.mubr.msk.bf16.mxu0 %vm842_vm1, %v840_v7  ;;  %v751_v13 = vld [vmem:[%s1024_s4 + $0x28] sm:$0xff]   ;;  %v753_v15 = vld [vmem:[%s1024_s4 + $0x38] sm:$0xff]   ;;  %vm311_vm6 = vcmask 777216   ;;  %vm313_vm7 = vcmask 785408   ;;  %s844_s14 = smov 64  }
  0x52   : > { %670 = vmatprep.subr.bf16.mxu0 %v840_v7  ;;  %696 = vmatprep.mubr.msk.f32.mxu1 %vm842_vm1, %v840_v7  ;;  %v750_v12 = vld [vmem:[%s1024_s4 + $0x20] sm:$0xff]   ;;  %vm646_vm8 = vmpackc.low %vm313_vm7, %vm313_vm7  ;;  %v459_v42 = vld [vmem:[#allocation6] sm:$0xff]  ;;  %v845_v45 = vmov 0.0|0.0   ;;  %s846_s15 = smov 96   ;;  %vm452_vm9 = vcmask 261120   ;;  %vm546_vm10 = vcmask 523264  }
  0x53   : > { %v460_v43 = vld [vmem:[#allocation6 + $0x8] sm:$0xff]  ;;  %v461_v44 = vld [vmem:[#allocation6 + $0x10] sm:$0xff]  ;;  %699 = vmatprep.subr.bf16.mxu1 %v845_v45  ;;  %v462_v47 = vld [vmem:[#allocation6 + $0x18] sm:$0xff] }
  0x54   : > { %298 = vrot.lane.b32.xlu0 %v296_v6, %s841_s23  ;;  %v700_v46 = vpack.c.bf16 %v460_v43, %v459_v42  ;;  %v703_v48 = vpack.c.bf16 %v462_v47, %v461_v44  ;;  %v650_v55 = vld [vmem:[#allocation6 + $0x20] ss:$0 sm:$0xff] }
  0x55   : > { %671 = vmatpush3.bf16.msra.mxu0 %v747_v8 }
  0x56   : > { %672 = vmatprep.subr.bf16.mxu0 %v840_v7  ;;  %701 = vmatpush3.bf16.msra.mxu1 %v700_v46 }
  0x57   : > { %702 = vmatprep.subr.bf16.mxu1 %v845_v45 }
  0x58   : > { %428 = vrot.lane.b32.xlu0 %v286_v11, %s843_s7 }
  0x59   : > { %673 = vmatpush3.bf16.msra.mxu0 %v748_v9 }
  0x5a   : > { %674 = vmatprep.subr.bf16.mxu0 %v840_v7  ;;  %704 = vmatpush3.bf16.msra.mxu1 %v703_v48 }
  0x5d   : > { %675 = vmatpush3.bf16.msra.mxu0 %v749_v10 }
  0x5e   : > { %676 = vmatprep.subr.bf16.mxu0 %v840_v7 }
  0x61   : > { %677 = vmatpush3.bf16.msra.mxu0 %v750_v12 }
  0x62   : > { %678 = vmatprep.subr.bf16.mxu0 %v840_v7 }
  0x65   : > { %679 = vmatpush3.bf16.msra.mxu0 %v751_v13 }
  0x66   : > { %680 = vmatprep.subr.bf16.mxu0 %v840_v7 }
  0x69   : > { %681 = vmatpush3.bf16.msra.mxu0 %v752_v14 }
  0x6a   : > { %682 = vmatprep.subr.bf16.mxu0 %v840_v7 }
  0x6d   : > { %683 = vmatpush3.bf16.msra.mxu0 %v753_v15 }
  0xc2   : > { %v303_v19 = vpop.permute.xlu1 %302 }
  0xcf   : > { %v292_v18 = vpop.permute.xlu0 %291 }
  0xd0   : > { %vm293_vm2 = vcmp.eq.s32.totalorder %v289_v17, %v292_v18 }
  0xd1   : > { %v637_v20 = vsel %vm293_vm2, 1.0, %v840_v7 }
  0xd3   : > { %v299_v21 = vpop.permute.xlu0 %298 }
  0xd4   : > { %v306_v22 = vsel %vm305_vm3, %v637_v20, %v299_v21 }
  0xd5   : > { %v308_v23 = vsel %vm307_vm4, %v306_v22, %v303_v19 }
  0xd6   : > { %v310_v24 = vsel %vm309_vm5, %v308_v23, 0.0 }
  0xd7   : > { %v312_v25 = vsel %vm311_vm6, %v310_v24, 1.0  ;;  %v429_v38 = vpop.permute.xlu0 %428 }
  0xd8   : > { %v647_v26 = vpack.c.bf16 %v312_v25, %v312_v25 }
  0xda   : > { %685 = vmatmul.mubr.msk.bf16.vlgmr.msra.gmra.mrb[0].mxu0 %vm646_vm8, %v647_v26 }
 0x1ad   : > { %v414_v27 = vpop.f32.mrb[0].mxu0 }
 0x1ae   : > { %754 = vtanh.f32 %v414_v27  ;;  %v686_v28 = vpop.f32.mrb[1].mxu0  ;;  %v649_v32 = vmul.f32 -1.442695, %v414_v27 }
 0x1af   : > { %v417_v29 = vpop.f32.mrb[2].mxu0 }
 0x1b0   : > { %v687_v30 = vpop.f32.mrb[3].mxu0  ;;  %756 = vpow2.f32 %v649_v32 }
 0x1b8   : > { %v755_v31 = vpop.eup %754 }
 0x1b9   : > { %433 = vrot.lane.b32.xlu1 %v755_v31, %s844_s14 }
 0x1ba   : > { %v757_v33 = vpop.eup %756 }
 0x1bb   : > { %v423_v34 = vadd.f32 1.0, %v757_v33 }
 0x1bd   : > { %758 = vrcp.f32 %v423_v34 }
 0x1c7   : > { %v759_v35 = vpop.eup %758 }
 0x1c8   : > { %v431_v39 = vmul.f32 %v759_v35, %v429_v38 }
 0x22b   : > { %v434_v36 = vpop.permute.xlu1 %433 }
 0x22c   : > { %v436_v37 = vmul.f32 %v759_v35, %v434_v36 }
 0x22e   : > { %438 = vrot.lane.b32.xlu1 %v436_v37, %s843_s7 }
 0x2a0   : > { %v439_v40 = vpop.permute.xlu1 %438 }
 0x2a1   : > { %v441_v41 = vadd.f32 %v439_v40, %v431_v39 }
 0x2a3   : > { %760 = vtanh.f32 %v441_v41 }
 0x2ad   : > { %v761_v49 = vpop.eup %760 }
 0x2ae   : > { %444 = vrot.lane.b32.xlu0 %v761_v49, %s844_s14 }
 0x320   : > { %v445_v50 = vpop.permute.xlu0 %444 }
 0x321   : > { %v447_v51 = vmul.f32 %v759_v35, %v445_v50 }
 0x323   : > { %540 = vrot.lane.b32.xlu0 %v447_v51, %s846_s15  ;;  %449 = vrot.lane.b32.xlu1 %v447_v51, %s843_s7 }
 0x327   : > { %455 = vrot.lane.b32.xlu0 %v441_v41, %s846_s15  ;;  %543 = vrot.lane.b32.xlu1 %v441_v41, %s844_s14 }
 0x395   : > { %v541_v52 = vpop.permute.xlu0 %540  ;;  %v450_v53 = vpop.permute.xlu1 %449 }
 0x396   : > { %453 = vst.msk [vmem:[#allocation2] sm:$0xff] %vm452_vm9, %v450_v53  ;;  %697 = vmatmul.mubr.msk.f32.vlgmr.msra.gmra.mrb[0].mxu1 %vm452_vm9, %v450_v53 }
 0x399   : > { %v456_v54 = vpop.permute.xlu0 %455  ;;  %v544_v59 = vpop.permute.xlu1 %543 }
 0x39a   : > { %458 = vst.msk [vmem:[#allocation3] sm:$0xff] %vm452_vm9, %v456_v54 }
 0x469   : > { %v536_v56 = vpop.f32.mrb[0].mxu1 }
 0x46a   : > { %v537_v57 = vadd.f32 %v650_v55, %v536_v56  ;;  %v698_v58 = vpop.f32.mrb[1].mxu1 }
 0x46c   : > { %v547_v60 = vsel %vm546_vm10, %v537_v57, %v541_v52 }
 0x46d   : > { %v548_v61 = vsel %vm313_vm7, %v547_v60, %v544_v59 }
 0x46e   : > { %549 = vst [vmem:[%s973_s12] sm:$0xff] %v548_v61 }
 0x46f PF: > { %s18_s21 = sadd.s32 1, %s832_s21  }
 0x470   : > { %p15_p10 = scmp.ge.s32.totalorder %s18_s21, 8  }
 0x472   :  { %17 = sbr.rel (!%p15_p10) target bundleno = 2 (0x2), region = 87 }
 0x479   :  { %569 = vsyncpa [#allocation5], 1 }
 0x47a   :  { %571 = vsyncpa [#allocation5 + $0x1], 1 }
 0x47b   :  { %572 = vsyncpa [#allocation7], 1 }

</bundles_post_ra>
